<compile_context>
chip_gen: v5e
topology: v5e:2x2
jax: 0.10.0
libtpu: 0.0.40
codegen_flags: <defaults>
</compile_context>

<pallas_src>
import functools

import jax
import jax.numpy as jnp
from jax.experimental import pallas as pl
from jax.experimental.pallas import tpu as pltpu


def _round_up(a, b):
    return ((a + b - 1) // b) * b


def _similar_cluster_kernel(has_mask, x_ref, neg2ct_ref, csq_ref, pc_ref, *rest):
    if has_mask:
        keep_ref, o_ref = rest
    else:
        (o_ref,) = rest
        keep_ref = None

    mm_dtype = neg2ct_ref.dtype                      # f32, or bf16 if requested
    x = x_ref[...].astype(mm_dtype)                  # (tm, Din)   streamed rows
    neg2ct = neg2ct_ref[...]                         # (Din, K)    resident: -2*C^T
    csq = csq_ref[...].astype(jnp.float32)           # (1, K)      resident: ||c||^2
    pc = pc_ref[...]                                 # (K, Dout)   resident: C@W^T + b

    tm = x.shape[0]
    n_clusters = csq.shape[1]

    # Squared-distance scores (argmin-equivalent to torch.cdist + argmin).
    scores = jnp.dot(x, neg2ct, preferred_element_type=jnp.float32) + csq  # (tm, K)

    # First-occurrence argmin along the cluster (lane) axis.
    min_s = jnp.min(scores, axis=-1, keepdims=True)                        # (tm, 1)
    lane = jax.lax.broadcasted_iota(jnp.int32, (tm, n_clusters), 1)        # (tm, K)
    idx = jnp.min(jnp.where(scores == min_s, lane, n_clusters),
                  axis=-1, keepdims=True)                                  # (tm, 1)
    onehot = (lane == idx).astype(mm_dtype)                                # (tm, K)

    # Gather + projection in one MXU matmul against the pre-projected table.
    out = jnp.dot(onehot, pc, preferred_element_type=jnp.float32)          # (tm, Dout)
    if has_mask:
        out = out * keep_ref[...].astype(jnp.float32)
    o_ref[...] = out.astype(o_ref.dtype)


def similar_cluster_encoder(x, cluster_centers, proj_w, proj_b,
                            src_masks=None, *, tm=512, use_bf16_matmul=False):
    """x: (B, T, Din); cluster_centers: (K, Din); proj_w: (Dout, Din); proj_b: (Dout,).
    src_masks: optional (B, T) bool, True = masked-out. Returns (B, T, Dout)."""
    B, T, Din = x.shape
    K, _ = cluster_centers.shape
    Dout = proj_w.shape[0]
    N = B * T

    # --- Constant tables, computed once in the wrapper (hoisted out of kernel) ---
    centers32 = cluster_centers.astype(jnp.float32)
    c_sq = jnp.sum(centers32 * centers32, axis=-1).reshape(1, K)           # (1, K)
    neg2ct = (-2.0 * centers32).T                                          # (Din, K)
    proj_centers = (centers32 @ proj_w.astype(jnp.float32).T
                    + proj_b.astype(jnp.float32))                          # (K, Dout)

    mm_dtype = jnp.bfloat16 if use_bf16_matmul else jnp.float32
    neg2ct = neg2ct.astype(mm_dtype)
    proj_centers = proj_centers.astype(mm_dtype)

    # --- Row tiling: big tiles, padded row count ---
    tm = max(8, min(int(tm), _round_up(N, 8)))
    tm = _round_up(tm, 8)
    n_pad = _round_up(N, tm)

    x_flat = x.reshape(N, Din)
    if n_pad != N:
        x_flat = jnp.pad(x_flat, ((0, n_pad - N), (0, 0)))

    has_mask = src_masks is not None
    in_specs = [
        pl.BlockSpec((tm, Din), lambda i: (i, 0)),      # x rows (streamed)
        pl.BlockSpec((Din, K), lambda i: (0, 0)),       # -2 * centers^T (resident)
        pl.BlockSpec((1, K), lambda i: (0, 0)),         # ||c||^2 (resident)
        pl.BlockSpec((K, Dout), lambda i: (0, 0)),      # centers @ W^T + b (resident)
    ]
    operands = [x_flat, neg2ct, c_sq, proj_centers]
    if has_mask:
        keep = (~src_masks).reshape(N, 1).astype(jnp.float32)
        if n_pad != N:
            keep = jnp.pad(keep, ((0, n_pad - N), (0, 0)))
        in_specs.append(pl.BlockSpec((tm, 1), lambda i: (i, 0)))
        operands.append(keep)

    grid = (n_pad // tm,)
    out_flat = pl.pallas_call(
        functools.partial(_similar_cluster_kernel, has_mask),
        out_shape=jax.ShapeDtypeStruct((n_pad, Dout), x.dtype),
        grid_spec=pltpu.PrefetchScalarGridSpec(
            num_scalar_prefetch=0,
            grid=grid,
            in_specs=in_specs,
            out_specs=pl.BlockSpec((tm, Dout), lambda i: (i, 0)),
        ),
        compiler_params=pltpu.CompilerParams(
            dimension_semantics=("parallel",)),
    )(*operands)

    return out_flat[:N].reshape(B, T, Dout)


def _reference(x, centers, w, b, src_masks=None):
    # Pure-JAX reference mirroring the PyTorch forward.
    d = jnp.linalg.norm(x[:, :, None, :] - centers[None, None, :, :], axis=-1)
    sel = jnp.argmin(d, axis=2)
    g = centers[sel]
    out = g @ w.T + b
    if src_masks is not None:
        out = out * (~src_masks)[..., None]
    return out


if __name__ == "__main__":
    key = jax.random.PRNGKey(0)
    k1, k2, k3, k4, k5, k6 = jax.random.split(key, 6)

    B, T = 2, 8
    n_clusters, input_size, output_size = 128, 32, 32

    x = jax.random.normal(k1, (B, T, input_size), jnp.float32)
    cluster_centers = jax.random.uniform(k2, (n_clusters, input_size), jnp.float32)
    proj_w = jax.random.normal(k3, (output_size, input_size), jnp.float32) * 0.05
    proj_b = jax.random.normal(k4, (output_size,), jnp.float32) * 0.05
    src_masks = jax.random.bernoulli(k5, 0.25, (B, T))

    # Masked path.
    out = jax.block_until_ready(
        similar_cluster_encoder(x, cluster_centers, proj_w, proj_b, src_masks))
    ref = _reference(x, cluster_centers, proj_w, proj_b, src_masks)
    assert out.shape == (B, T, output_size)
    assert jnp.allclose(out, ref, atol=1e-4, rtol=1e-4), "mismatch vs reference"

    # No-mask path (no keep input materialized at all).
    out2 = jax.block_until_ready(
        similar_cluster_encoder(x, cluster_centers, proj_w, proj_b, None))
    ref2 = _reference(x, cluster_centers, proj_w, proj_b, None)
    assert jnp.allclose(out2, ref2, atol=1e-4, rtol=1e-4), "mismatch (no mask)"

    # Larger run: exercises the big default tile (tm=512), row padding
    # (N=1200 -> 1536) and a multi-step parallel grid.
    Bl, Tl = 4, 300
    xl = jax.random.normal(k6, (Bl, Tl, input_size), jnp.float32)
    maskl = jax.random.bernoulli(k5, 0.25, (Bl, Tl))
    out3 = jax.block_until_ready(
        similar_cluster_encoder(xl, cluster_centers, proj_w, proj_b, maskl))
    ref3 = _reference(xl, cluster_centers, proj_w, proj_b, maskl)
    assert out3.shape == (Bl, Tl, output_size)
    assert jnp.allclose(out3, ref3, atol=1e-4, rtol=1e-4), "mismatch (large)"

    print("KERNEL_OK")
</pallas_src>

<mosaic_0001>
module attributes {stable_mosaic.version = 11 : i64} {
  func.func @_similar_cluster_kernel(%arg0: i32, %arg1: memref<16x32xf32, #tpu.memory_space<vmem>>, %arg2: memref<32x128xf32, #tpu.memory_space<vmem>>, %arg3: memref<1x128xf32, #tpu.memory_space<vmem>>, %arg4: memref<128x32xf32, #tpu.memory_space<vmem>>, %arg5: memref<16x1xf32, #tpu.memory_space<vmem>>, %arg6: memref<16x32xf32, #tpu.memory_space<vmem>>) attributes {dimension_semantics = [#tpu.dimension_semantics<parallel>], iteration_bounds = array<i64: 1>, scalar_prefetch = 0 : i64, scratch_operands = 0 : i64, tpu.core_type = #tpu.core_type<tc>, window_params = [{transform_indices = @transform_0, window_bounds = array<i64: 16, 32>}, {pipeline_mode = #tpu.pipeline_mode<synchronous>, transform_indices = @transform_1, window_bounds = array<i64: 32, 128>}, {pipeline_mode = #tpu.pipeline_mode<synchronous>, transform_indices = @transform_2, window_bounds = array<i64: 1, 128>}, {pipeline_mode = #tpu.pipeline_mode<synchronous>, transform_indices = @transform_3, window_bounds = array<i64: 128, 32>}, {transform_indices = @transform_4, window_bounds = array<i64: 16, 1>}, {transform_indices = @transform_5, window_bounds = array<i64: 16, 32>}]} {
    %c0 = arith.constant 0 : index
    %c0_0 = arith.constant 0 : index
    %0 = vector.load %arg1[%c0, %c0_0] : memref<16x32xf32, #tpu.memory_space<vmem>>, vector<16x32xf32>
    %c0_1 = arith.constant 0 : index
    %c0_2 = arith.constant 0 : index
    %1 = vector.load %arg2[%c0_1, %c0_2] : memref<32x128xf32, #tpu.memory_space<vmem>>, vector<32x128xf32>
    %c0_3 = arith.constant 0 : index
    %c0_4 = arith.constant 0 : index
    %2 = vector.load %arg3[%c0_3, %c0_4] : memref<1x128xf32, #tpu.memory_space<vmem>>, vector<1x128xf32>
    %c0_5 = arith.constant 0 : index
    %c0_6 = arith.constant 0 : index
    %3 = vector.load %arg4[%c0_5, %c0_6] : memref<128x32xf32, #tpu.memory_space<vmem>>, vector<128x32xf32>
    %cst = arith.constant dense<0.000000e+00> : vector<16x128xf32>
    %4 = tpu.matmul %0, %1, %cst {dimension_numbers = #tpu.dot_dimension_numbers<[1], [0], [0], [1], [0, 0, 1, 1], [], []>} : vector<16x32xf32>, vector<32x128xf32>, vector<16x128xf32> -> vector<16x128xf32>
    %5 = vector.broadcast %2 : vector<1x128xf32> to vector<16x128xf32>
    %6 = arith.addf %4, %5 : vector<16x128xf32>
    %cst_7 = arith.constant dense<0x7F800000> : vector<16xf32>
    %7 = vector.multi_reduction <minimumf>, %6, %cst_7 [1] : vector<16x128xf32> to vector<16xf32>
    %8 = vector.shape_cast %7 : vector<16xf32> to vector<16x1xf32>
    %9 = tpu.iota {dimensions = array<i32: 1>} : vector<16x128xi32>
    %10 = vector.broadcast %8 : vector<16x1xf32> to vector<16x128xf32>
    %11 = arith.cmpf oeq, %6, %10 : vector<16x128xf32>
    %c128_i32 = arith.constant 128 : i32
    %12 = vector.broadcast %c128_i32 : i32 to vector<16x128xi32>
    %13 = arith.select %11, %9, %12 : vector<16x128xi1>, vector<16x128xi32>
    %cst_8 = arith.constant dense<2147483647> : vector<16xi32>
    %14 = vector.multi_reduction <minsi>, %13, %cst_8 [1] : vector<16x128xi32> to vector<16xi32>
    %15 = vector.shape_cast %14 : vector<16xi32> to vector<16x1xi32>
    %16 = vector.broadcast %15 : vector<16x1xi32> to vector<16x128xi32>
    %17 = arith.cmpi eq, %9, %16 : vector<16x128xi32>
    %18 = arith.extui %17 : vector<16x128xi1> to vector<16x128xi32>
    %19 = arith.sitofp %18 : vector<16x128xi32> to vector<16x128xf32>
    %cst_9 = arith.constant dense<0.000000e+00> : vector<16x32xf32>
    %20 = tpu.matmul %19, %3, %cst_9 {dimension_numbers = #tpu.dot_dimension_numbers<[1], [0], [0], [1], [0, 0, 1, 1], [], []>} : vector<16x128xf32>, vector<128x32xf32>, vector<16x32xf32> -> vector<16x32xf32>
    %c0_10 = arith.constant 0 : index
    %c0_11 = arith.constant 0 : index
    %21 = vector.load %arg5[%c0_10, %c0_11] : memref<16x1xf32, #tpu.memory_space<vmem>>, vector<16x1xf32>
    %22 = vector.broadcast %21 : vector<16x1xf32> to vector<16x32xf32>
    %23 = arith.mulf %20, %22 : vector<16x32xf32>
    %c0_12 = arith.constant 0 : index
    %c0_13 = arith.constant 0 : index
    %24 = vector.load %arg6[%c0_12, %c0_13] : memref<16x32xf32, #tpu.memory_space<vmem>>, vector<16x32xf32>
    tpu.vector_store %arg6[%c0_12, %c0_13], %23 {strides = array<i32>} : memref<16x32xf32, #tpu.memory_space<vmem>>, vector<16x32xf32>,
    return
  }
  func.func @transform_0(%arg0: i32) -> (i32, i32) {
    %c0_i32 = arith.constant 0 : i32
    %c0_i32_0 = arith.constant 0 : i32
    return %arg0, %c0_i32 : i32, i32
  }
  func.func @transform_1(%arg0: i32) -> (i32, i32) {
    %c0_i32 = arith.constant 0 : i32
    %c0_i32_0 = arith.constant 0 : i32
    %c0_i32_1 = arith.constant 0 : i32
    return %c0_i32, %c0_i32_0 : i32, i32
  }
  func.func @transform_2(%arg0: i32) -> (i32, i32) {
    %c0_i32 = arith.constant 0 : i32
    %c0_i32_0 = arith.constant 0 : i32
    %c0_i32_1 = arith.constant 0 : i32
    return %c0_i32, %c0_i32_0 : i32, i32
  }
  func.func @transform_3(%arg0: i32) -> (i32, i32) {
    %c0_i32 = arith.constant 0 : i32
    %c0_i32_0 = arith.constant 0 : i32
    %c0_i32_1 = arith.constant 0 : i32
    return %c0_i32, %c0_i32_0 : i32, i32
  }
  func.func @transform_4(%arg0: i32) -> (i32, i32) {
    %c0_i32 = arith.constant 0 : i32
    %c0_i32_0 = arith.constant 0 : i32
    return %arg0, %c0_i32 : i32, i32
  }
  func.func @transform_5(%arg0: i32) -> (i32, i32) {
    %c0_i32 = arith.constant 0 : i32
    %c0_i32_0 = arith.constant 0 : i32
    return %arg0, %c0_i32 : i32, i32
  }
}

</mosaic_0001>

<bundles_post_ra>
// kernel: tpu_custom_call.1
= control target key start
LH: loop header
LB: loop body
LE: loop exit
PB: predicated region body
PF: predicated region fallthrough
CT: control target
= control target key end

     0   :  { %s357_s0 = inlined_call_operand.vmem [shape: f32[16,32], index: 0, kind: input, shape index: {}]   ;;  %s358_s1 = inlined_call_operand.vmem [shape: f32[32,128], index: 1, kind: input, shape index: {}]   ;;  %s359_s2 = inlined_call_operand.vmem [shape: f32[1,128], index: 2, kind: input, shape index: {}]   ;;  %s360_s3 = inlined_call_operand.vmem [shape: f32[128,32], index: 3, kind: input, shape index: {}]   ;;  %s361_s4 = inlined_call_operand.vmem [shape: f32[16,1], index: 4, kind: input, shape index: {}]   ;;  %s362_s5 = inlined_call_operand.hbm [shape: f32[16,32], index: 5, kind: output, shape index: {}]  }
   0x1   :  { %v26_v0 = vld [vmem:[%s358_s1 + $0x18] sm:$0xff]  ;;  %v25_v1 = vld [vmem:[%s358_s1 + $0x10] sm:$0xff]  ;;  %v24_v2 = vld [vmem:[%s358_s1 + $0x8] sm:$0xff] }
   0x2   :  { %66 = vmatpush.msra.mxu0 %v26_v0 }
   0x3   :  { %10 = vsyncpa [#allocation3], 0  ;;  %v23_v3 = vld [vmem:[%s358_s1] sm:$0xff]  ;;  %vm47_vm0 = vcmask 261120   ;;  %v22_v5 = vld [vmem:[%s357_s0 + $0x8] sm:$0xff]  ;;  %v81_v11 = vlaneseq  ;;  %v234_v47 = vmov 0  }
   0x4   :  { %67 = vmatpush.msra.mxu0 %v25_v1  ;;  %v21_v4 = vld [vmem:[%s357_s0] sm:$0xff]  ;;  %v43_v21 = vld [vmem:[%s360_s3 + $0x78] sm:$0xff]  ;;  %v42_v22 = vld [vmem:[%s360_s3 + $0x70] sm:$0xff]  ;;  %206 = vset.pattern.permute.xlu1 %v234_v47  ;;  %v235_v54 = vmov 1.0   ;;  %s166_s14 = sshll.u32 %s362_s5, 4  ;;  %s237_s15 = smov 128   ;;  %s167_s14 = int_to_ptr.hbm [resolvable:$true] %s166_s14 }
   0x5   :  { %v207_v7 = vld [vmem:[%s359_s2] ss:$0 sm:$0xff]  ;;  %v292_v12 = vand.u32 127, %v81_v11  ;;  %184 = vmatpush.msra.mxu2 %v43_v21  ;;  %121 = vmatpush.msra.mxu1 %v43_v21  ;;  %v41_v23 = vld [vmem:[%s360_s3 + $0x68] sm:$0xff]  ;;  %v39_v25 = vld [vmem:[%s360_s3 + $0x58] sm:$0xff]  ;;  %s238_s16 = smov 8  }
   0x6   :  { %68 = vmatpush.msra.mxu0 %v24_v2  ;;  %v40_v24 = vld [vmem:[%s360_s3 + $0x60] sm:$0xff]  ;;  %v38_v26 = vld [vmem:[%s360_s3 + $0x50] sm:$0xff]  ;;  %v37_v27 = vld [vmem:[%s360_s3 + $0x48] sm:$0xff]  ;;  %205 = vset.pattern.permute.xlu0 %v234_v47 }
   0x7   :  { %185 = vmatpush.msra.mxu2 %v42_v22  ;;  %122 = vmatpush.msra.mxu1 %v42_v22  ;;  %v36_v28 = vld [vmem:[%s360_s3 + $0x40] sm:$0xff]  ;;  %v35_v29 = vld [vmem:[%s360_s3 + $0x38] sm:$0xff]  ;;  %v34_v30 = vld [vmem:[%s360_s3 + $0x30] sm:$0xff] }
   0x8   :  { %69 = vmatpush.msra.mxu0 %v23_v3  ;;  %v33_v32 = vld [vmem:[%s360_s3 + $0x28] sm:$0xff]  ;;  %v32_v33 = vld [vmem:[%s360_s3 + $0x20] sm:$0xff]  ;;  %v31_v36 = vld [vmem:[%s360_s3 + $0x18] sm:$0xff] }
   0x9   :  { %178 = vmatmul.msk.f32.vlgmr.msra.gmra.mxu0 %vm47_vm0, %v21_v4  ;;  %186 = vmatpush.msra.mxu2 %v41_v23  ;;  %v30_v42 = vld [vmem:[%s360_s3 + $0x10] sm:$0xff]  ;;  %v29_v43 = vld [vmem:[%s360_s3 + $0x8] sm:$0xff]  ;;  %v28_v44 = vld [vmem:[%s360_s3] sm:$0xff]  ;;  %s236_s3 = smov [#allocation2]  }
   0xa   :  { %123 = vmatpush.msra.mxu1 %v41_v23  ;;  %v145_v45 = vld [vmem:[%s361_s4 + $0x8] sm:$0xff]  ;;  %v144_v46 = vld [vmem:[%s361_s4] sm:$0xff]  ;;  %s164_s4 = sshll.u32 %s236_s3, 4  ;;  %s165_s4 = int_to_ptr.vmem [resolvable:$true] %s164_s4 }
   0xb   :  { %187 = vmatpush.msra.mxu2 %v40_v24 }
   0xc   :  { %124 = vmatpush.msra.mxu1 %v40_v24 }
   0xd   :  { %188 = vmatpush.msra.mxu2 %v39_v25 }
   0xe   :  { %125 = vmatpush.msra.mxu1 %v39_v25 }
   0xf   :  { %189 = vmatpush.msra.mxu2 %v38_v26 }
  0x10   :  { %126 = vmatpush.msra.mxu1 %v38_v26 }
  0x11   :  { %179 = vmatmul.msk.f32.gmra.mxu0 %vm47_vm0, %v22_v5  ;;  %190 = vmatpush.msra.mxu2 %v37_v27 }
  0x12   :  { %127 = vmatpush.msra.mxu1 %v37_v27 }
  0x13   :  { %191 = vmatpush.msra.mxu2 %v36_v28 }
  0x14   :  { %128 = vmatpush.msra.mxu1 %v36_v28 }
  0x15   :  { %192 = vmatpush.msra.mxu2 %v35_v29 }
  0x16   :  { %129 = vmatpush.msra.mxu1 %v35_v29 }
  0x17   :  { %193 = vmatpush.msra.mxu2 %v34_v30 }
  0x18   :  { %130 = vmatpush.msra.mxu1 %v34_v30 }
  0x19   :  { %194 = vmatpush.msra.mxu2 %v33_v32 }
  0x1a   :  { %131 = vmatpush.msra.mxu1 %v33_v32 }
  0x1b   :  { %195 = vmatpush.msra.mxu2 %v32_v33 }
  0x1c   :  { %132 = vmatpush.msra.mxu1 %v32_v33 }
  0x1d   :  { %196 = vmatpush.msra.mxu2 %v31_v36 }
  0x1e   :  { %133 = vmatpush.msra.mxu1 %v31_v36 }
  0x1f   :  { %197 = vmatpush.msra.mxu2 %v30_v42 }
  0x20   :  { %134 = vmatpush.msra.mxu1 %v30_v42 }
  0x21   :  { %198 = vmatpush.msra.mxu2 %v29_v43 }
  0x22   :  { %135 = vmatpush.msra.mxu1 %v29_v43 }
  0x23   :  { %199 = vmatpush.msra.mxu2 %v28_v44 }
  0x24   :  { %136 = vmatpush.msra.mxu1 %v28_v44 }
  0x86   :  { %v71_v6 = vpop.f32.mrf.mxu0 }
  0x87   :  { %v72_v10 = vadd.f32 %v207_v7, %v71_v6 }
  0x8e   :  { %v74_v8 = vpop.f32.mrf.mxu0 }
  0x8f   :  { %v75_v9 = vadd.f32 %v207_v7, %v74_v8 }
  0x91   :  { %79 = vmin.xlane.f32.xlu0 %v75_v9 }
  0x99   :  { %77 = vmin.xlane.f32.xlu0 %v72_v10 }
  0xad   :  { %148 = vperm.xlu0 %205, %v144_v46  }
 0x104   :  { %v80_v13 = vpop.xlane.xlu0 %79 }
 0x105   :  { %vm84_vm1 = vcmp.eq.f32.partialorder %v75_v9, %v80_v13 }
 0x106   :  { %v86_v14 = vsel %vm84_vm1, %v292_v12, 128 }
 0x107   :  { %v102_v15 = vshra.s32 %v86_v14, 16  ;;  %v101_v31 = vand.u32 65535, %v86_v14 }
 0x109   :  { %v104_v16 = vcvt.s32.f32 %v102_v15  ;;  %v103_v35 = vcvt.s32.f32 %v101_v31 }
 0x10b   :  { %105 = vmin.xlane.f32.xlu1 %v104_v16 }
 0x10c   :  { %v78_v17 = vpop.xlane.xlu0 %77 }
 0x10d   :  { %vm83_vm2 = vcmp.eq.f32.partialorder %v72_v10, %v78_v17 }
 0x10e   :  { %v85_v18 = vsel %vm83_vm2, %v292_v12, 128 }
 0x10f   :  { %v88_v19 = vshra.s32 %v85_v18, 16  ;;  %v87_v38 = vand.u32 65535, %v85_v18 }
 0x111   :  { %v90_v20 = vcvt.s32.f32 %v88_v19  ;;  %v89_v40 = vcvt.s32.f32 %v87_v38 }
 0x113   :  { %91 = vmin.xlane.f32.xlu1 %v90_v20 }
 0x11f   :  { %v149_v61 = vpop.permute.xlu0 %148 }
 0x12c   :  { %153 = vperm.xlu1 %206, %v145_v45  }
 0x17e   :  { %v106_v34 = vpop.xlane.xlu1 %105 }
 0x17f   :  { %vm107_vm3 = vcmp.eq.f32.partialorder %v104_v16, %v106_v34  ;;  %v112_v48 = vcvt.f32.s32 %v106_v34 }
 0x180   :  { %v108_v37 = vsel %vm107_vm3, %v103_v35, inf }
 0x181   :  { %109 = vmin.xlane.f32.xlu2 %v108_v37  ;;  %v113_v50 = vshll.u32 %v112_v48, 16 }
 0x186   :  { %v92_v39 = vpop.xlane.xlu1 %91 }
 0x187   :  { %vm93_vm4 = vcmp.eq.f32.partialorder %v90_v20, %v92_v39  ;;  %v98_v53 = vcvt.f32.s32 %v92_v39 }
 0x188   :  { %v94_v41 = vsel %vm93_vm4, %v89_v40, inf }
 0x189   :  { %95 = vmin.xlane.f32.xlu2 %v94_v41  ;;  %v99_v56 = vshll.u32 %v98_v53, 16 }
 0x19e   :  { %v154_v59 = vpop.permute.xlu1 %153 }
 0x1f4   :  { %v110_v49 = vpop.xlane.xlu2 %109 }
 0x1f5   :  { %v111_v51 = vcvt.f32.s32 %v110_v49 }
 0x1f7   :  { %v114_v52 = vadd.s32 %v113_v50, %v111_v51 }
 0x1f9   :  { %vm116_vm5 = vcmp.eq.s32.totalorder %v292_v12, %v114_v52 }
 0x1fa   :  { %183 = vmatmul.msk.f32.vlgmr.msra.gmra.mxu2 %vm116_vm5, %v235_v54 }
 0x1fc   :  { %v96_v55 = vpop.xlane.xlu2 %95 }
 0x1fd   :  { %v97_v57 = vcvt.f32.s32 %v96_v55 }
 0x1ff   :  { %v100_v58 = vadd.s32 %v99_v56, %v97_v57 }
 0x201   :  { %vm115_vm6 = vcmp.eq.s32.totalorder %v292_v12, %v100_v58 }
 0x202   :  { %182 = vmatmul.msk.f32.vlgmr.msra.gmra.mxu1 %vm115_vm6, %v235_v54 }
 0x27d   :  { %v141_v60 = vpop.f32.mrf.mxu2 }
 0x27e   :  { %v157_v62 = vmul.f32 %v154_v59, %v141_v60 }
 0x27f   :  { %v138_v63 = vpop.f32.mrf.mxu1 }
 0x280   :  { %159 = vst.msk [vmem:[#allocation2 + $0x8] sm:$0xff] %vm47_vm0, %v157_v62  ;;  %v156_v0 = vmul.f32 %v149_v61, %v138_v63 }
 0x282   :  { %158 = vst.msk [vmem:[#allocation2] sm:$0xff] %vm47_vm0, %v156_v0 }
 0x283   :  { %172 = dma.vmem_to_hbm [thread:$0]  %s165_s4, 256, %s167_s14, [#allocation3], %s237_s15, %s237_s15, %s238_s16  }
 0x284   :  { %232 = dma.done.wait [#allocation3], 256  }
 0x285   :  { %233 = vsyncadd [#allocation3], 4294967040 }
 0x286   :  { %177 = vsyncpa [#allocation3], 1 }

</bundles_post_ra>
